<compile_context>
chip_gen: v7x
topology: tpu7x:2x2x1
jax: 0.10.0
libtpu: 0.0.40
codegen_flags: <defaults>
</compile_context>

<pallas_src>
import functools

import jax
import jax.numpy as jnp
from jax.experimental import pallas as pl
from jax.experimental.pallas import tpu as pltpu


def _round_up(x, m):
    return ((x + m - 1) // m) * m


def mlp_kernel(x_ref, w1_ref, b1_ref, w2_ref, b2_ref, out_ref):
    # Linear1: bf16 inputs into the MXU (cast happens in VMEM, no extra HBM pass), f32 acc.
    x_bf16 = x_ref[...].astype(jnp.bfloat16)                                   # (TB, D)
    h = jnp.dot(x_bf16, w1_ref[...], preferred_element_type=jnp.float32)       # (TB, 20)
    h = jnp.maximum(h + b1_ref[...], 0.0)
    # Linear2 (f32).
    logits = jnp.dot(h, w2_ref[...], preferred_element_type=jnp.float32)       # (TB, 4)
    logits = logits + b2_ref[...]
    # softmax along dim=1 (f32 epilogue; approx reciprocal runs on the EUP slot ~ free).
    m = jnp.max(logits, axis=1, keepdims=True)
    e = jnp.exp(logits - m)
    denom = jnp.sum(e, axis=1, keepdims=True)
    out_ref[...] = (e * pl.reciprocal(denom, approx=True)).astype(out_ref.dtype)


def _choose_tile_b(B, D, *, target_tile_bytes=4 << 20, vmem_input_budget=12 << 20):
    """Pick a batch-tile size: big enough to amortize per-step overhead (~0.35 us),
    small enough that two double-buffered f32 x tiles fit a conservative VMEM budget,
    and yielding >= 2 grid steps (so both v7x TensorCores get work) when B allows."""
    row_bytes = D * 4  # x is f32 in HBM/VMEM (cast to bf16 only inside the kernel)
    tile_b = max(8, target_tile_bytes // row_bytes)
    tile_b = min(tile_b, max(8, vmem_input_budget // (2 * row_bytes)))  # 2x double-buffered
    if B > 16:
        # Force >= 2 tiles so ("parallel",) shards across both TCs on v7x.
        tile_b = min(tile_b, _round_up(pl.cdiv(B, 2), 8))
    else:
        tile_b = min(tile_b, _round_up(B, 8))
    return _round_up(tile_b, 8)


@functools.partial(jax.jit, static_argnames=())
def torch_model_forward(x, w1, b1, w2, b2):
    """x: (B, D) f32; w1: (D, 20); b1: (20,); w2: (20, 4); b2: (4,).
    Returns (probs (B, 4) f32, label (B,) int32) -- matches TorchModel.forward(x)."""
    B, D = x.shape
    H = w1.shape[1]
    C = w2.shape[1]

    # Tiny, loaded-once operands: cast/reshape in the wrapper (negligible bytes).
    w1_in = w1.astype(jnp.bfloat16)          # (D, 20), VMEM-resident across all tiles
    w2_in = w2.astype(jnp.float32)           # (20, 4)
    b1_2d = b1.reshape(1, H).astype(jnp.float32)
    b2_2d = b2.reshape(1, C).astype(jnp.float32)

    tile_b = _choose_tile_b(B, D)
    grid = (pl.cdiv(B, tile_b),)             # ragged last tile handled by Pallas OOB masking

    grid_spec = pltpu.PrefetchScalarGridSpec(
        num_scalar_prefetch=0,
        grid=grid,
        in_specs=[
            pl.BlockSpec((tile_b, D), lambda i: (i, 0)),   # x: tiled over batch
            pl.BlockSpec((D, H), lambda i: (0, 0)),        # weights stay VMEM-resident
            pl.BlockSpec((1, H), lambda i: (0, 0)),
            pl.BlockSpec((H, C), lambda i: (0, 0)),
            pl.BlockSpec((1, C), lambda i: (0, 0)),
        ],
        out_specs=pl.BlockSpec((tile_b, C), lambda i: (i, 0)),
    )

    probs = pl.pallas_call(
        mlp_kernel,
        out_shape=jax.ShapeDtypeStruct((B, C), jnp.float32),
        grid_spec=grid_spec,
        compiler_params=pltpu.CompilerParams(
            dimension_semantics=("parallel",),      # shards batch tiles across TCs on v7x
            vmem_limit_bytes=32 * 1024 * 1024,      # safe on v5e (16 MiB default) and v7x (64 MiB phys)
        ),
    )(x, w1_in, b1_2d, w2_in, b2_2d)

    # argmax over probs as a trailing XLA op (traffic ~ B*16 bytes: negligible).
    label = jnp.argmax(probs, axis=1).astype(jnp.int32)
    return probs, label


def init_params(key, input_size, hidden=20, nclass=4):
    # Deterministic init mimicking PyTorch nn.Linear default:
    # U(-1/sqrt(fan_in), 1/sqrt(fan_in)) for both weight and bias; stored as (in, out).
    k1, k2, k3, k4 = jax.random.split(key, 4)
    lim1 = 1.0 / jnp.sqrt(jnp.float32(input_size))
    lim2 = 1.0 / jnp.sqrt(jnp.float32(hidden))
    w1 = jax.random.uniform(k1, (input_size, hidden), jnp.float32, -lim1, lim1)
    b1 = jax.random.uniform(k2, (hidden,), jnp.float32, -lim1, lim1)
    w2 = jax.random.uniform(k3, (hidden, nclass), jnp.float32, -lim2, lim2)
    b2 = jax.random.uniform(k4, (nclass,), jnp.float32, -lim2, lim2)
    return w1, b1, w2, b2


if __name__ == "__main__":
    # TODO(synk): training-path CrossEntropyLoss branch (forward(x, y)) not implemented;
    # only the inference branch (probs, label) is reproduced here.
    key = jax.random.PRNGKey(0)
    kx, kp = jax.random.split(key)

    # B=200 is not a multiple of the chosen tile (104) -> exercises the no-pad ragged
    # last block and the >=2-grid-step (megacore) path.
    batch, input_size = 200, 32
    x = jax.random.normal(kx, (batch, input_size), jnp.float32)
    w1, b1, w2, b2 = init_params(kp, input_size)

    probs, label = torch_model_forward(x, w1, b1, w2, b2)
    probs = jax.block_until_ready(probs)
    label = jax.block_until_ready(label)
    assert probs.shape == (batch, 4) and label.shape == (batch,)

    # rows of softmax output must sum to ~1 (approx reciprocal tolerance)
    assert bool(jnp.all(jnp.abs(probs.sum(axis=1) - 1.0) < 5e-3)), "softmax rows do not sum to 1"

    # f32 reference (loose tolerance -- kernel feeds bf16 x/w1 into the MXU)
    h_ref = jnp.maximum(x @ w1 + b1, 0.0)
    logits_ref = h_ref @ w2 + b2
    probs_ref = jax.nn.softmax(logits_ref, axis=1)
    label_ref = jnp.argmax(probs_ref, axis=1).astype(jnp.int32)
    assert jnp.allclose(probs, probs_ref, atol=3e-2), "probs mismatch vs f32 reference"

    # bf16-matched reference (tight tolerance; slack covers the approx reciprocal)
    h_b = jnp.maximum(
        jnp.dot(x.astype(jnp.bfloat16), w1.astype(jnp.bfloat16),
                preferred_element_type=jnp.float32) + b1, 0.0)
    probs_b = jax.nn.softmax(jnp.dot(h_b, w2, preferred_element_type=jnp.float32) + b2,
                             axis=1)
    assert jnp.allclose(probs, probs_b, atol=5e-3), "probs mismatch vs bf16 reference"

    # labels must agree with the f32 reference on all rows whose top-2 probability gap
    # exceeds the bf16 input-quantization noise
    top2 = jnp.sort(probs_ref, axis=1)[:, -2:]
    confident = (top2[:, 1] - top2[:, 0]) > 1e-2
    assert bool(jnp.all(jnp.where(confident, label == label_ref, True))), "label mismatch"

    print("KERNEL_OK")
</pallas_src>

<mosaic_0001>
module attributes {stable_mosaic.version = 11 : i64} {
  func.func @mlp_kernel(%arg0: i32, %arg1: memref<104x32xf32, #tpu.memory_space<vmem>>, %arg2: memref<32x20xbf16, #tpu.memory_space<vmem>>, %arg3: memref<1x20xf32, #tpu.memory_space<vmem>>, %arg4: memref<20x4xf32, #tpu.memory_space<vmem>>, %arg5: memref<1x4xf32, #tpu.memory_space<vmem>>, %arg6: memref<104x4xf32, #tpu.memory_space<vmem>>) attributes {dimension_semantics = [#tpu.dimension_semantics<parallel>], iteration_bounds = array<i64: 2>, scalar_prefetch = 0 : i64, scratch_operands = 0 : i64, tpu.core_type = #tpu.core_type<tc>, window_params = [{transform_indices = @transform_0, window_bounds = array<i64: 104, 32>}, {pipeline_mode = #tpu.pipeline_mode<synchronous>, transform_indices = @transform_1, window_bounds = array<i64: 32, 20>}, {pipeline_mode = #tpu.pipeline_mode<synchronous>, transform_indices = @transform_2, window_bounds = array<i64: 1, 20>}, {pipeline_mode = #tpu.pipeline_mode<synchronous>, transform_indices = @transform_3, window_bounds = array<i64: 20, 4>}, {pipeline_mode = #tpu.pipeline_mode<synchronous>, transform_indices = @transform_4, window_bounds = array<i64: 1, 4>}, {transform_indices = @transform_5, window_bounds = array<i64: 104, 4>}]} {
    %c0 = arith.constant 0 : index
    %c0_0 = arith.constant 0 : index
    %0 = vector.load %arg1[%c0, %c0_0] : memref<104x32xf32, #tpu.memory_space<vmem>>, vector<104x32xf32>
    %1 = arith.truncf %0 : vector<104x32xf32> to vector<104x32xbf16>
    %c0_1 = arith.constant 0 : index
    %c0_2 = arith.constant 0 : index
    %2 = vector.load %arg2[%c0_1, %c0_2] : memref<32x20xbf16, #tpu.memory_space<vmem>>, vector<32x20xbf16>
    %cst = arith.constant dense<0.000000e+00> : vector<104x20xf32>
    %3 = tpu.matmul %1, %2, %cst {dimension_numbers = #tpu.dot_dimension_numbers<[1], [0], [0], [1], [0, 0, 1, 1], [], []>} : vector<104x32xbf16>, vector<32x20xbf16>, vector<104x20xf32> -> vector<104x20xf32>
    %c0_3 = arith.constant 0 : index
    %c0_4 = arith.constant 0 : index
    %4 = vector.load %arg3[%c0_3, %c0_4] : memref<1x20xf32, #tpu.memory_space<vmem>>, vector<1x20xf32>
    %5 = vector.broadcast %4 : vector<1x20xf32> to vector<104x20xf32>
    %6 = arith.addf %3, %5 : vector<104x20xf32>
    %cst_5 = arith.constant 0.000000e+00 : f32
    %7 = vector.broadcast %cst_5 : f32 to vector<104x20xf32>
    %8 = arith.maximumf %6, %7 : vector<104x20xf32>
    %c0_6 = arith.constant 0 : index
    %c0_7 = arith.constant 0 : index
    %9 = vector.load %arg4[%c0_6, %c0_7] : memref<20x4xf32, #tpu.memory_space<vmem>>, vector<20x4xf32>
    %cst_8 = arith.constant dense<0.000000e+00> : vector<104x4xf32>
    %10 = tpu.matmul %8, %9, %cst_8 {dimension_numbers = #tpu.dot_dimension_numbers<[1], [0], [0], [1], [0, 0, 1, 1], [], []>} : vector<104x20xf32>, vector<20x4xf32>, vector<104x4xf32> -> vector<104x4xf32>
    %c0_9 = arith.constant 0 : index
    %c0_10 = arith.constant 0 : index
    %11 = vector.load %arg5[%c0_9, %c0_10] : memref<1x4xf32, #tpu.memory_space<vmem>>, vector<1x4xf32>
    %12 = vector.broadcast %11 : vector<1x4xf32> to vector<104x4xf32>
    %13 = arith.addf %10, %12 : vector<104x4xf32>
    %cst_11 = arith.constant dense<0xFF800000> : vector<104xf32>
    %14 = vector.multi_reduction <maximumf>, %13, %cst_11 [1] : vector<104x4xf32> to vector<104xf32>
    %15 = vector.shape_cast %14 : vector<104xf32> to vector<104x1xf32>
    %16 = vector.broadcast %15 : vector<104x1xf32> to vector<104x4xf32>
    %17 = arith.subf %13, %16 : vector<104x4xf32>
    %18 = math.exp %17 : vector<104x4xf32>
    %cst_12 = arith.constant dense<0.000000e+00> : vector<104xf32>
    %19 = vector.multi_reduction <add>, %18, %cst_12 [1] : vector<104x4xf32> to vector<104xf32>
    %20 = vector.shape_cast %19 : vector<104xf32> to vector<104x1xf32>
    %21 = tpu.reciprocal %20 {approx = true} : vector<104x1xf32> -> vector<104x1xf32>
    %22 = vector.broadcast %21 : vector<104x1xf32> to vector<104x4xf32>
    %23 = arith.mulf %18, %22 : vector<104x4xf32>
    %c0_13 = arith.constant 0 : index
    %c0_14 = arith.constant 0 : index
    %24 = vector.load %arg6[%c0_13, %c0_14] : memref<104x4xf32, #tpu.memory_space<vmem>>, vector<104x4xf32>
    tpu.vector_store %arg6[%c0_13, %c0_14], %23 {strides = array<i32>} : memref<104x4xf32, #tpu.memory_space<vmem>>, vector<104x4xf32>,
    return
  }
  func.func @transform_0(%arg0: i32) -> (i32, i32) {
    %c0_i32 = arith.constant 0 : i32
    %c0_i32_0 = arith.constant 0 : i32
    return %arg0, %c0_i32 : i32, i32
  }
  func.func @transform_1(%arg0: i32) -> (i32, i32) {
    %c0_i32 = arith.constant 0 : i32
    %c0_i32_0 = arith.constant 0 : i32
    %c0_i32_1 = arith.constant 0 : i32
    return %c0_i32, %c0_i32_0 : i32, i32
  }
  func.func @transform_2(%arg0: i32) -> (i32, i32) {
    %c0_i32 = arith.constant 0 : i32
    %c0_i32_0 = arith.constant 0 : i32
    %c0_i32_1 = arith.constant 0 : i32
    return %c0_i32, %c0_i32_0 : i32, i32
  }
  func.func @transform_3(%arg0: i32) -> (i32, i32) {
    %c0_i32 = arith.constant 0 : i32
    %c0_i32_0 = arith.constant 0 : i32
    %c0_i32_1 = arith.constant 0 : i32
    return %c0_i32, %c0_i32_0 : i32, i32
  }
  func.func @transform_4(%arg0: i32) -> (i32, i32) {
    %c0_i32 = arith.constant 0 : i32
    %c0_i32_0 = arith.constant 0 : i32
    %c0_i32_1 = arith.constant 0 : i32
    return %c0_i32, %c0_i32_0 : i32, i32
  }
  func.func @transform_5(%arg0: i32) -> (i32, i32) {
    %c0_i32 = arith.constant 0 : i32
    %c0_i32_0 = arith.constant 0 : i32
    return %arg0, %c0_i32 : i32, i32
  }
}

</mosaic_0001>

<bundles_post_ra>
// kernel: torch_model_forward.1
= control target key start
LH: loop header
LB: loop body
LE: loop exit
PB: predicated region body
PF: predicated region fallthrough
CT: control target
= control target key end

     0   :  { %s1439_s18 = smov 0   ;;  %s1441_s19 = smov 0   ;;  %s1853_s0 = inlined_call_operand.vmem [shape: f32[200,32], index: 0, kind: input, shape index: {}]   ;;  %s1854_s1 = inlined_call_operand.vmem [shape: bf16[32,20], index: 1, kind: input, shape index: {}]   ;;  %s1855_s2 = inlined_call_operand.vmem [shape: f32[1,20], index: 2, kind: input, shape index: {}]   ;;  %s1856_s3 = inlined_call_operand.vmem [shape: f32[20,4], index: 3, kind: input, shape index: {}]   ;;  %s1857_s4 = inlined_call_operand.vmem [shape: f32[1,4], index: 4, kind: input, shape index: {}]   ;;  %s1858_s5 = inlined_call_operand.vmem [shape: f32[200,4], index: 5, kind: output, shape index: {}]  }
   0x1   :  { %s1443_s20 = smov 0  }
   0x2 LB: > { %s1452_s21 = sadd.s32 4294967295, %s1372_s20   ;;  %s1454_s22 = sadd.s32 1, %s1372_s20   ;;  %s1372_s20 = sphi %s1443_s20, %s1865_s20   ;;  %s1368_s19 = sphi %s1441_s19, %s1864_s19   ;;  %s1364_s18 = sphi %s1439_s18, %s1863_s18  }
   0x3   : > { %s129_s23 = ssub.s32 %s1372_s20, %s1454_s22  ;;  %s132_s24 = sadd.s32 1, %s1368_s19 }
   0x4   : > { %p130_p0 = scmp.eq.s32.totalorder %s129_s23, 0  ;;  %p142_p1 = scmp.ne.s32.totalorder %s1368_s19, %s1364_s18 }
   0x5   : > { %p143_p2 = scmp.eq.s32.totalorder %s1452_s21, 1  ;;  %p1022_p3 = scmp.ge.s32.totalorder %s1372_s20, 1 }
   0x6   : > { %s1462_s25 = scalar_select %p130_p0, %s1368_s19, %s132_s24  }
   0x7   : > { %p1464_p4 = por %p143_p2, %p142_p1  ;;  %p196_p5 = scmp.lt.s32.totalorder %s1372_s20, 3 }
   0x9   : > { %p197_p6 = pnand %p1022_p3, %p196_p5 }
   0xa   : > { %v1260_v0 = vld [vmem:[%s1854_s1] sm:$0xff] (!%p197_p6)   ;;  %v1406_v1 = vmov (!%p197_p6), 0.0   ;;  %v1261_v2 = vld [vmem:[%s1854_s1 + $0x8] sm:$0xff] (!%p197_p6)   ;;  %vm1407_vm0 = vmmov (!%p197_p6), 0   ;;  %s1478_s6 = smul.u32 (!%p197_p6), 13, %s1452_s21  ;;  %v1408_v3 = vmov (!%p197_p6), 0.0|0.0  }
   0xb   : > { %200 = sbr.rel (%p197_p6) target bundleno = 879 (0x36f), region = 40  ;;  %1087 = vmatprep.subr.bf16.mxu0 (!%p197_p6), %v1406_v1  ;;  %1091 = vmatprep.mubr.msk.bf16.mxu0 (!%p197_p6), %vm1407_vm0, %v1406_v1  ;;  %vm290_vm1 = vcmask (!%p197_p6), 261120   ;;  %v413_v24 = vld [vmem:[%s1856_s3] sm:$0xff] (!%p197_p6)  ;;  %v414_v25 = vld [vmem:[%s1856_s3 + $0x8] sm:$0xff] (!%p197_p6)  ;;  %v415_v27 = vld [vmem:[%s1856_s3 + $0x10] sm:$0xf] (!%p197_p6) }
   0xc   : > { %1088 = vmatpush3.bf16.msra.mxu0 (!%p197_p6), %v1260_v0  ;;  %1164 = vmatprep.subr.bf16.mxu1 (!%p197_p6), %v1408_v3  ;;  %p232_p7 = scmp.lt.s32.totalorder (!%p197_p6), %s1478_s6, 24  ;;  %v1165_v26 = vpack.c.bf16 (!%p197_p6), %v414_v25, %v413_v24  ;;  %vm463_vm2 = vcmask (!%p197_p6), 1043456   ;;  %v1535_v28 = vld [vmem:[%s1855_s2] ss:$0 sm:$0xff] (!%p197_p6)  ;;  %vm423_vm3 = vcmask (!%p197_p6), 162816   ;;  %vm597_vm4 = vcmask (!%p197_p6), 31744  }
   0xd   : > { %1089 = vmatprep.subr.bf16.mxu0 (!%p197_p6), %v1406_v1  ;;  %1125 = vmatprep.mubr.msk.f32.mxu1 (!%p197_p6), %vm1407_vm0, %v1406_v1  ;;  %s224_s28 = sand.u32 (!%p197_p6), 1, %s1364_s18  }
   0xe   : > { %1166 = vmatpush3.bf16.msra.mxu1 (!%p197_p6), %v1165_v26  ;;  %s1167_s29 = smul.u32 (!%p197_p6), 104, %s224_s28 }
   0xf   : > { %1123 = vmatprep.subr.mxu1 (!%p197_p6), %v1406_v1 }
  0x10   : > { %1090 = vmatpush3.bf16.msra.mxu0 (!%p197_p6), %v1261_v2  ;;  %s1724_s30 = scalar_lea.vmem (!%p197_p6), [#allocation2], %s1167_s29  }
  0x12   : > { %s233_s7 = scalar_select %p232_p7, %s1478_s6, 24  ;;  %1124 = vmatpush3.msk.msra.mxu1 %vm463_vm2, %v415_v27 }
  0x13   : > { %s762_s18 = ssub.s32 (%p1464_p4), 25, %s1478_s6 }
  0x14   : > { %s1023_s8 = sshll.u32 %s233_s7, 3  ;;  %s1061_s7 = smul.u32 (%p1464_p4), 104, %s1452_s21 }
  0x15   : > { %s1488_s11 = scalar_lea.vmem %s1853_s0, %s1023_s8  ;;  %p763_p8 = scmp.lt.s32.totalorder (%p1464_p4), %s762_s18, 13 }
  0x16   : > { %v247_v4 = vld [vmem:[%s1488_s11] sm:$0xff]  ;;  %v248_v5 = vld [vmem:[%s1488_s11 + $0x8] sm:$0xff]  ;;  %v249_v7 = vld [vmem:[%s1488_s11 + $0x10] sm:$0xff]  ;;  %s1771_s10 = scalar_lea.vmem (%p1464_p4), %s1858_s5, %s1061_s7  }
  0x17   : > { %v260_v6 = vpack.c.bf16 %v248_v5, %v247_v4  ;;  %v250_v8 = vld [vmem:[%s1488_s11 + $0x18] sm:$0xff]  ;;  %v251_v10 = vld [vmem:[%s1488_s11 + $0x20] sm:$0xff]  ;;  %v252_v11 = vld [vmem:[%s1488_s11 + $0x28] sm:$0xff] }
  0x18   : > { %v261_v9 = vpack.c.bf16 %v250_v8, %v249_v7  ;;  %v262_v12 = vpack.c.bf16 %v252_v11, %v251_v10  ;;  %v253_v13 = vld [vmem:[%s1488_s11 + $0x30] sm:$0xff]  ;;  %v254_v14 = vld [vmem:[%s1488_s11 + $0x38] sm:$0xff]  ;;  %v255_v16 = vld [vmem:[%s1488_s11 + $0x40] sm:$0xff] }
  0x19   : > { %1092 = vmatmul.mubr.msk.bf16.vlgmr.msra.gmra.mrb[0].mxu0 %vm290_vm1, %v260_v6  ;;  %v263_v15 = vpack.c.bf16 %v254_v14, %v253_v13  ;;  %v256_v17 = vld [vmem:[%s1488_s11 + $0x48] sm:$0xff]  ;;  %v257_v19 = vld [vmem:[%s1488_s11 + $0x50] sm:$0xff]  ;;  %v258_v20 = vld [vmem:[%s1488_s11 + $0x58] sm:$0xff] }
  0x1a   : > { %1095 = vmatprep.mubr.msk.bf16.mxu0 %vm1407_vm0, %v1406_v1  ;;  %v264_v18 = vpack.c.bf16 %v256_v17, %v255_v16  ;;  %v265_v21 = vpack.c.bf16 %v258_v20, %v257_v19  ;;  %v259_v22 = vld [vmem:[%s1488_s11 + $0x60] sm:$0xff] }
  0x1b   : > { %v266_v23 = vpack.c.bf16 %v259_v22, %v259_v22  ;;  %v1590_v20 = vld [vmem:[%s1857_s4] ss:$0 sm:$0xff] }
  0x21   : > { %1096 = vmatmul.mubr.msk.bf16.gmra.mrb[4].mxu0 %vm290_vm1, %v261_v9 }
  0x22   : > { %1099 = vmatprep.mubr.msk.bf16.mxu0 %vm1407_vm0, %v1406_v1 }
  0x29   : > { %1100 = vmatmul.mubr.msk.bf16.gmra.mrb[8].mxu0 %vm290_vm1, %v262_v12 }
  0x2a   : > { %1103 = vmatprep.mubr.msk.bf16.mxu0 %vm1407_vm0, %v1406_v1 }
  0x31   : > { %1104 = vmatmul.mubr.msk.bf16.gmra.mrb[12].mxu0 %vm290_vm1, %v263_v15 }
  0x32   : > { %1107 = vmatprep.mubr.msk.bf16.mxu0 %vm1407_vm0, %v1406_v1 }
  0x39   : > { %1108 = vmatmul.mubr.msk.bf16.gmra.mrb[16].mxu0 %vm290_vm1, %v264_v18 }
  0x3a   : > { %1111 = vmatprep.mubr.msk.bf16.mxu0 %vm1407_vm0, %v1406_v1 }
  0x41   : > { %1112 = vmatmul.mubr.msk.bf16.gmra.mrb[20].mxu0 %vm290_vm1, %v265_v21 }
  0x42   : > { %1115 = vmatprep.mubr.msk.bf16.mxu0 %vm1407_vm0, %v1406_v1 }
  0x49   : > { %1116 = vmatmul.mubr.msk.bf16.gmra.mrb[24].mxu0 %vm290_vm1, %v266_v23 }
  0xec   : > { %v346_v29 = vpop.f32.mrb[0].mxu0 }
  0xed   : > { %v347_v30 = vadd.f32 %v1535_v28, %v346_v29  ;;  %v1093_v31 = vpop.f32.mrb[1].mxu0 }
  0xee   : > { %v349_v32 = vpop.f32.mrb[2].mxu0 }
  0xef   : > { %v400_v33 = vmax.f32 %v347_v30, 0.0  ;;  %v350_v34 = vadd.f32 %v1535_v28, %v349_v32  ;;  %v1094_v35 = vpop.f32.mrb[3].mxu0 }
  0xf1   : > { %1126 = vmatmul.mubr.msk.f32.vlgmr.msra.gmra.mrb[0].mxu1 %vm423_vm3, %v400_v33  ;;  %v401_v36 = vmax.f32 %v350_v34, 0.0 }
  0xf2   : > { %1128 = vmatprep.mubr.msk.f32.mxu1 %vm1407_vm0, %v1406_v1 }
  0xf4   : > { %v354_v37 = vpop.f32.mrb[4].mxu0 }
  0xf5   : > { %v355_v38 = vadd.f32 %v1535_v28, %v354_v37  ;;  %v1097_v39 = vpop.f32.mrb[5].mxu0  ;;  %1129 = vmatmul.mubr.msk.f32.gmra.mrb[2].mxu1 %vm423_vm3, %v401_v36 }
  0xf6   : > { %v357_v40 = vpop.f32.mrb[6].mxu0  ;;  %1131 = vmatprep.mubr.msk.f32.mxu1 %vm1407_vm0, %v1406_v1 }
  0xf7   : > { %v402_v41 = vmax.f32 %v355_v38, 0.0  ;;  %v358_v42 = vadd.f32 %v1535_v28, %v357_v40  ;;  %v1098_v43 = vpop.f32.mrb[7].mxu0 }
  0xf9   : > { %1132 = vmatmul.mubr.msk.f32.gmra.mrb[4].mxu1 %vm423_vm3, %v402_v41  ;;  %v403_v44 = vmax.f32 %v358_v42, 0.0 }
  0xfa   : > { %1134 = vmatprep.mubr.msk.f32.mxu1 %vm1407_vm0, %v1406_v1 }
  0xfc   : > { %v362_v45 = vpop.f32.mrb[8].mxu0 }
  0xfd   : > { %v363_v46 = vadd.f32 %v1535_v28, %v362_v45  ;;  %v1101_v47 = vpop.f32.mrb[9].mxu0  ;;  %1135 = vmatmul.mubr.msk.f32.gmra.mrb[6].mxu1 %vm423_vm3, %v403_v44 }
  0xfe   : > { %v365_v48 = vpop.f32.mrb[10].mxu0  ;;  %1137 = vmatprep.mubr.msk.f32.mxu1 %vm1407_vm0, %v1406_v1 }
  0xff   : > { %v404_v49 = vmax.f32 %v363_v46, 0.0  ;;  %v366_v50 = vadd.f32 %v1535_v28, %v365_v48  ;;  %v1102_v51 = vpop.f32.mrb[11].mxu0 }
 0x101   : > { %1138 = vmatmul.mubr.msk.f32.gmra.mrb[8].mxu1 %vm423_vm3, %v404_v49  ;;  %v405_v52 = vmax.f32 %v366_v50, 0.0 }
 0x102   : > { %1140 = vmatprep.mubr.msk.f32.mxu1 %vm1407_vm0, %v1406_v1 }
 0x104   : > { %v370_v53 = vpop.f32.mrb[12].mxu0 }
 0x105   : > { %v371_v54 = vadd.f32 %v1535_v28, %v370_v53  ;;  %v1105_v55 = vpop.f32.mrb[13].mxu0  ;;  %1141 = vmatmul.mubr.msk.f32.gmra.mrb[10].mxu1 %vm423_vm3, %v405_v52 }
 0x106   : > { %v373_v56 = vpop.f32.mrb[14].mxu0  ;;  %1143 = vmatprep.mubr.msk.f32.mxu1 %vm1407_vm0, %v1406_v1 }
 0x107   : > { %v406_v57 = vmax.f32 %v371_v54, 0.0  ;;  %v374_v58 = vadd.f32 %v1535_v28, %v373_v56  ;;  %v1106_v59 = vpop.f32.mrb[15].mxu0 }
 0x109   : > { %1144 = vmatmul.mubr.msk.f32.gmra.mrb[12].mxu1 %vm423_vm3, %v406_v57  ;;  %v407_v60 = vmax.f32 %v374_v58, 0.0 }
 0x10a   : > { %1146 = vmatprep.mubr.msk.f32.mxu1 %vm1407_vm0, %v1406_v1 }
 0x10c   : > { %v378_v61 = vpop.f32.mrb[16].mxu0 }
 0x10d   : > { %v379_v62 = vadd.f32 %v1535_v28, %v378_v61  ;;  %v1109_v63 = vpop.f32.mrb[17].mxu0  ;;  %1147 = vmatmul.mubr.msk.f32.gmra.mrb[14].mxu1 %vm423_vm3, %v407_v60 }
 0x10e   : > { %v381_v0 = vpop.f32.mrb[18].mxu0  ;;  %1149 = vmatprep.mubr.msk.f32.mxu1 %vm1407_vm0, %v1406_v1 }
 0x10f   : > { %v408_v2 = vmax.f32 %v379_v62, 0.0  ;;  %v382_v3 = vadd.f32 %v1535_v28, %v381_v0  ;;  %v1110_v4 = vpop.f32.mrb[19].mxu0 }
 0x111   : > { %1150 = vmatmul.mubr.msk.f32.gmra.mrb[16].mxu1 %vm423_vm3, %v408_v2  ;;  %v409_v5 = vmax.f32 %v382_v3, 0.0 }
 0x112   : > { %1152 = vmatprep.mubr.msk.f32.mxu1 %vm1407_vm0, %v1406_v1 }
 0x114   : > { %v386_v6 = vpop.f32.mrb[20].mxu0 }
 0x115   : > { %v387_v7 = vadd.f32 %v1535_v28, %v386_v6  ;;  %v1113_v8 = vpop.f32.mrb[21].mxu0  ;;  %1153 = vmatmul.mubr.msk.f32.gmra.mrb[18].mxu1 %vm423_vm3, %v409_v5 }
 0x116   : > { %v389_v9 = vpop.f32.mrb[22].mxu0  ;;  %1155 = vmatprep.mubr.msk.f32.mxu1 %vm1407_vm0, %v1406_v1 }
 0x117   : > { %v410_v10 = vmax.f32 %v387_v7, 0.0  ;;  %v390_v11 = vadd.f32 %v1535_v28, %v389_v9  ;;  %v1114_v12 = vpop.f32.mrb[23].mxu0 }
 0x119   : > { %1156 = vmatmul.mubr.msk.f32.gmra.mrb[20].mxu1 %vm423_vm3, %v410_v10  ;;  %v411_v13 = vmax.f32 %v390_v11, 0.0 }
 0x11a   : > { %1158 = vmatprep.mubr.msk.f32.mxu1 %vm1407_vm0, %v1406_v1 }
 0x11c   : > { %v394_v14 = vpop.f32.mrb[24].mxu0 }
 0x11d   : > { %v395_v15 = vadd.f32 %v1535_v28, %v394_v14  ;;  %v1117_v16 = vpop.f32.mrb[25].mxu0  ;;  %1159 = vmatmul.mubr.msk.f32.gmra.mrb[22].mxu1 %vm423_vm3, %v411_v13 }
 0x11e   : > { %v397_v17 = vpop.f32.mrb[26].mxu0  ;;  %1161 = vmatprep.mubr.msk.f32.mxu1 %vm1407_vm0, %v1406_v1 }
 0x11f   : > { %v412_v18 = vmax.f32 %v395_v15, 0.0  ;;  %v1118_v19 = vpop.f32.mrb[27].mxu0 }
 0x121   : > { %1162 = vmatmul.mubr.msk.f32.gmra.mrb[24].mxu1 %vm423_vm3, %v412_v18 }
 0x1c4   : > { %v533_v21 = vpop.f32.mrb[0].mxu1 }
 0x1c5   : > { %v1593_v22 = vadd.f32 %v1590_v20, %v533_v21  ;;  %v1127_v23 = vpop.f32.mrb[1].mxu1 }
 0x1c7   : > { %v598_v24 = vsel %vm597_vm4, %v1593_v22, -inf }
 0x1c8   : > { %599 = vmax.xlane.f32.xlu0 %v598_v24  ;;  %v538_v1 = vpop.f32.mrb[2].mxu1 }
 0x1c9   : > { %v1598_v25 = vadd.f32 %v1590_v20, %v538_v1  ;;  %v1130_v26 = vpop.f32.mrb[3].mxu1 }
 0x1cb   : > { %v601_v27 = vsel %vm597_vm4, %v1598_v25, -inf }
 0x1cc   : > { %602 = vmax.xlane.f32.xlu0 %v601_v27  ;;  %v543_v28 = vpop.f32.mrb[4].mxu1 }
 0x1cd   : > { %v1603_v29 = vadd.f32 %v1590_v20, %v543_v28  ;;  %v1133_v30 = vpop.f32.mrb[5].mxu1 }
 0x1cf   : > { %v604_v31 = vsel %vm597_vm4, %v1603_v29, -inf }
 0x1d0   : > { %605 = vmax.xlane.f32.xlu1 %v604_v31  ;;  %v548_v32 = vpop.f32.mrb[6].mxu1 }
 0x1d1   : > { %v1608_v33 = vadd.f32 %v1590_v20, %v548_v32  ;;  %v1136_v34 = vpop.f32.mrb[7].mxu1 }
 0x1d3   : > { %v607_v35 = vsel %vm597_vm4, %v1608_v33, -inf }
 0x1d4   : > { %608 = vmax.xlane.f32.xlu1 %v607_v35  ;;  %v553_v36 = vpop.f32.mrb[8].mxu1 }
 0x1d5   : > { %v1613_v37 = vadd.f32 %v1590_v20, %v553_v36  ;;  %v1139_v38 = vpop.f32.mrb[9].mxu1 }
 0x1d7   : > { %v610_v39 = vsel %vm597_vm4, %v1613_v37, -inf }
 0x1d8   : > { %611 = vmax.xlane.f32.xlu0 %v610_v39  ;;  %v558_v40 = vpop.f32.mrb[10].mxu1 }
 0x1d9   : > { %v1618_v41 = vadd.f32 %v1590_v20, %v558_v40  ;;  %v1142_v42 = vpop.f32.mrb[11].mxu1 }
 0x1db   : > { %v613_v43 = vsel %vm597_vm4, %v1618_v41, -inf }
 0x1dc   : > { %614 = vmax.xlane.f32.xlu1 %v613_v43  ;;  %v563_v44 = vpop.f32.mrb[12].mxu1 }
 0x1dd   : > { %v1623_v45 = vadd.f32 %v1590_v20, %v563_v44  ;;  %v1145_v46 = vpop.f32.mrb[13].mxu1 }
 0x1df   : > { %v616_v47 = vsel %vm597_vm4, %v1623_v45, -inf }
 0x1e0   : > { %617 = vmax.xlane.f32.xlu0 %v616_v47  ;;  %v568_v48 = vpop.f32.mrb[14].mxu1 }
 0x1e1   : > { %v1628_v49 = vadd.f32 %v1590_v20, %v568_v48  ;;  %v1148_v50 = vpop.f32.mrb[15].mxu1 }
 0x1e3   : > { %v619_v51 = vsel %vm597_vm4, %v1628_v49, -inf }
 0x1e4   : > { %620 = vmax.xlane.f32.xlu1 %v619_v51  ;;  %v573_v52 = vpop.f32.mrb[16].mxu1 }
 0x1e5   : > { %v1633_v53 = vadd.f32 %v1590_v20, %v573_v52  ;;  %v1151_v54 = vpop.f32.mrb[17].mxu1 }
 0x1e7   : > { %v622_v55 = vsel %vm597_vm4, %v1633_v53, -inf }
 0x1e8   : > { %623 = vmax.xlane.f32.xlu0 %v622_v55  ;;  %v578_v56 = vpop.f32.mrb[18].mxu1 }
 0x1e9   : > { %v1638_v57 = vadd.f32 %v1590_v20, %v578_v56  ;;  %v1154_v58 = vpop.f32.mrb[19].mxu1 }
 0x1eb   : > { %v625_v59 = vsel %vm597_vm4, %v1638_v57, -inf }
 0x1ec   : > { %626 = vmax.xlane.f32.xlu1 %v625_v59  ;;  %v583_v60 = vpop.f32.mrb[20].mxu1 }
 0x1ed   : > { %v1643_v61 = vadd.f32 %v1590_v20, %v583_v60  ;;  %v1157_v62 = vpop.f32.mrb[21].mxu1 }
 0x1ef   : > { %v628_v63 = vsel %vm597_vm4, %v1643_v61, -inf }
 0x1f0   : > { %629 = vmax.xlane.f32.xlu0 %v628_v63  ;;  %v588_v0 = vpop.f32.mrb[22].mxu1 }
 0x1f1   : > { %v1648_v2 = vadd.f32 %v1590_v20, %v588_v0  ;;  %v1160_v3 = vpop.f32.mrb[23].mxu1 }
 0x1f3   : > { %v631_v4 = vsel %vm597_vm4, %v1648_v2, -inf }
 0x1f4   : > { %632 = vmax.xlane.f32.xlu1 %v631_v4  ;;  %v593_v5 = vpop.f32.mrb[24].mxu1 }
 0x1f5   : > { %v1653_v6 = vadd.f32 %v1590_v20, %v593_v5  ;;  %v1163_v7 = vpop.f32.mrb[25].mxu1 }
 0x1f7   : > { %v634_v8 = vsel %vm597_vm4, %v1653_v6, -inf }
 0x1f8   : > { %635 = vmax.xlane.f32.xlu0 %v634_v8 }
 0x255   : > { %v600_v9 = vpop.xlane.xlu0 %599 }
 0x256   : > { %v637_v10 = vsub.f32 %v1593_v22, %v600_v9 }
 0x258   : > { %v650_v11 = vmul.f32 1.442695, %v637_v10 }
 0x259   : > { %v603_v12 = vpop.xlane.xlu0 %602 }
 0x25a   : > { %1262 = vpow2.f32 %v650_v11  ;;  %v638_v13 = vsub.f32 %v1598_v25, %v603_v12 }
 0x25c   : > { %v652_v14 = vmul.f32 1.442695, %v638_v13 }
 0x25d   : > { %v606_v15 = vpop.xlane.xlu1 %605 }
 0x25e   : > { %1264 = vpow2.f32 %v652_v14  ;;  %v639_v16 = vsub.f32 %v1603_v29, %v606_v15 }
 0x260   : > { %v654_v17 = vmul.f32 1.442695, %v639_v16 }
 0x261   : > { %v609_v18 = vpop.xlane.xlu1 %608 }
 0x262   : > { %1266 = vpow2.f32 %v654_v17  ;;  %v640_v19 = vsub.f32 %v1608_v33, %v609_v18 }
 0x264   : > { %v1661_v20 = vpop.eup %1262  ;;  %v656_v21 = vmul.f32 1.442695, %v640_v19 }
 0x265   : > { %v612_v23 = vpop.xlane.xlu0 %611  ;;  %v676_v22 = vsel %vm597_vm4, %v1661_v20, 0.0 }
 0x266   : > { %1268 = vpow2.f32 %v656_v21  ;;  %v641_v24 = vsub.f32 %v1613_v37, %v612_v23  ;;  %677 = vadd.xlane.f32.xlu1 %v676_v22 }
 0x268   : > { %v1666_v1 = vpop.eup %1264  ;;  %v658_v25 = vmul.f32 1.442695, %v641_v24 }
 0x269   : > { %v615_v26 = vpop.xlane.xlu1 %614  ;;  %v679_v27 = vsel %vm597_vm4, %v1666_v1, 0.0 }
 0x26a   : > { %1270 = vpow2.f32 %v658_v25  ;;  %v642_v28 = vsub.f32 %v1618_v41, %v615_v26  ;;  %680 = vadd.xlane.f32.xlu0 %v679_v27 }
 0x26c   : > { %v1671_v29 = vpop.eup %1266  ;;  %v660_v30 = vmul.f32 1.442695, %v642_v28 }
 0x26d   : > { %v618_v31 = vpop.xlane.xlu0 %617  ;;  %v682_v32 = vsel %vm597_vm4, %v1671_v29, 0.0 }
 0x26e   : > { %1272 = vpow2.f32 %v660_v30  ;;  %v643_v33 = vsub.f32 %v1623_v45, %v618_v31  ;;  %683 = vadd.xlane.f32.xlu1 %v682_v32 }
 0x270   : > { %v1676_v34 = vpop.eup %1268  ;;  %v662_v35 = vmul.f32 1.442695, %v643_v33 }
 0x271   : > { %v621_v36 = vpop.xlane.xlu1 %620  ;;  %v685_v37 = vsel %vm597_vm4, %v1676_v34, 0.0 }
 0x272   : > { %1274 = vpow2.f32 %v662_v35  ;;  %v644_v38 = vsub.f32 %v1628_v49, %v621_v36  ;;  %686 = vadd.xlane.f32.xlu0 %v685_v37 }
 0x274   : > { %v1681_v39 = vpop.eup %1270  ;;  %v664_v40 = vmul.f32 1.442695, %v644_v38 }
 0x275   : > { %v624_v41 = vpop.xlane.xlu0 %623  ;;  %v688_v42 = vsel %vm597_vm4, %v1681_v39, 0.0 }
 0x276   : > { %1276 = vpow2.f32 %v664_v40  ;;  %v645_v43 = vsub.f32 %v1633_v53, %v624_v41  ;;  %689 = vadd.xlane.f32.xlu1 %v688_v42 }
 0x278   : > { %v1686_v44 = vpop.eup %1272  ;;  %v666_v45 = vmul.f32 1.442695, %v645_v43 }
 0x279   : > { %v627_v46 = vpop.xlane.xlu1 %626  ;;  %v691_v47 = vsel %vm597_vm4, %v1686_v44, 0.0 }
 0x27a   : > { %1278 = vpow2.f32 %v666_v45  ;;  %v646_v48 = vsub.f32 %v1638_v57, %v627_v46  ;;  %692 = vadd.xlane.f32.xlu0 %v691_v47 }
 0x27c   : > { %v1691_v49 = vpop.eup %1274  ;;  %v668_v50 = vmul.f32 1.442695, %v646_v48 }
 0x27d   : > { %v630_v51 = vpop.xlane.xlu0 %629  ;;  %v694_v52 = vsel %vm597_vm4, %v1691_v49, 0.0 }
 0x27e   : > { %1280 = vpow2.f32 %v668_v50  ;;  %v647_v53 = vsub.f32 %v1643_v61, %v630_v51  ;;  %695 = vadd.xlane.f32.xlu1 %v694_v52 }
 0x280   : > { %v1696_v54 = vpop.eup %1276  ;;  %v670_v55 = vmul.f32 1.442695, %v647_v53 }
 0x281   : > { %v633_v56 = vpop.xlane.xlu1 %632  ;;  %v697_v58 = vsel %vm597_vm4, %v1696_v54, 0.0 }
 0x282   : > { %1282 = vpow2.f32 %v670_v55  ;;  %v648_v57 = vsub.f32 %v1648_v2, %v633_v56  ;;  %698 = vadd.xlane.f32.xlu0 %v697_v58 }
 0x284   : > { %v1701_v59 = vpop.eup %1278  ;;  %v672_v60 = vmul.f32 1.442695, %v648_v57 }
 0x285   : > { %v636_v62 = vpop.xlane.xlu0 %635  ;;  %v700_v63 = vsel %vm597_vm4, %v1701_v59, 0.0 }
 0x286   : > { %1284 = vpow2.f32 %v672_v60  ;;  %v649_v61 = vsub.f32 %v1653_v6, %v636_v62  ;;  %701 = vadd.xlane.f32.xlu1 %v700_v63 }
 0x288   : > { %v1706_v0 = vpop.eup %1280  ;;  %v674_v3 = vmul.f32 1.442695, %v649_v61 }
 0x289   : > { %v703_v4 = vsel %vm597_vm4, %v1706_v0, 0.0 }
 0x28a   : > { %1286 = vpow2.f32 %v674_v3  ;;  %704 = vadd.xlane.f32.xlu0 %v703_v4 }
 0x28c   : > { %v1710_v2 = vpop.eup %1282 }
 0x28d   : > { %v706_v5 = vsel %vm597_vm4, %v1710_v2, 0.0 }
 0x28e   : > { %707 = vadd.xlane.f32.xlu1 %v706_v5 }
 0x290   : > { %v1714_v7 = vpop.eup %1284 }
 0x291   : > { %v709_v6 = vsel %vm597_vm4, %v1714_v7, 0.0 }
 0x292   : > { %710 = vadd.xlane.f32.xlu0 %v709_v6 }
 0x294   : > { %v1718_v8 = vpop.eup %1286 }
 0x295   : > { %v712_v9 = vsel %vm597_vm4, %v1718_v8, 0.0 }
 0x296   : > { %713 = vadd.xlane.f32.xlu1 %v712_v9 }
 0x2f3   : > { %v678_v10 = vpop.xlane.xlu1 %677 }
 0x2f4   : > { %1288 = vrcp.f32 %v678_v10 }
 0x2f7   : > { %v681_v11 = vpop.xlane.xlu0 %680 }
 0x2f8   : > { %1290 = vrcp.f32 %v681_v11 }
 0x2fb   : > { %v684_v12 = vpop.xlane.xlu1 %683 }
 0x2fc   : > { %1292 = vrcp.f32 %v684_v12 }
 0x2fe   : > { %v1289_v13 = vpop.eup %1288 }
 0x2ff   : > { %v728_v14 = vmul.f32 %v1289_v13, %v1661_v20  ;;  %v687_v15 = vpop.xlane.xlu0 %686 }
 0x300   : > { %1294 = vrcp.f32 %v687_v15 }
 0x301   : > { %741 = vst.msk [vmem:[%s1724_s30] sm:$0xff] %vm597_vm4, %v728_v14 }
 0x302   : > { %v1291_v16 = vpop.eup %1290 }
 0x303   : > { %v729_v17 = vmul.f32 %v1291_v16, %v1666_v1  ;;  %v690_v18 = vpop.xlane.xlu1 %689 }
 0x304   : > { %1296 = vrcp.f32 %v690_v18 }
 0x305   : > { %742 = vst.msk [vmem:[%s1724_s30 + $0x8] sm:$0xff] %vm597_vm4, %v729_v17 }
 0x306   : > { %v1293_v19 = vpop.eup %1292 }
 0x307   : > { %v730_v20 = vmul.f32 %v1293_v19, %v1671_v29  ;;  %v693_v21 = vpop.xlane.xlu0 %692 }
 0x308   : > { %1298 = vrcp.f32 %v693_v21 }
 0x309   : > { %743 = vst.msk [vmem:[%s1724_s30 + $0x10] sm:$0xff] %vm597_vm4, %v730_v20 }
 0x30a   : > { %v1295_v23 = vpop.eup %1294 }
 0x30b   : > { %v731_v22 = vmul.f32 %v1295_v23, %v1676_v34  ;;  %v696_v24 = vpop.xlane.xlu1 %695 }
 0x30c   : > { %1300 = vrcp.f32 %v696_v24 }
 0x30d   : > { %744 = vst.msk [vmem:[%s1724_s30 + $0x18] sm:$0xff] %vm597_vm4, %v731_v22 }
 0x30e   : > { %v1297_v1 = vpop.eup %1296 }
 0x30f   : > { %v732_v25 = vmul.f32 %v1297_v1, %v1681_v39  ;;  %v699_v26 = vpop.xlane.xlu0 %698 }
 0x310   : > { %1302 = vrcp.f32 %v699_v26 }
 0x311   : > { %745 = vst.msk [vmem:[%s1724_s30 + $0x20] sm:$0xff] %vm597_vm4, %v732_v25 }
 0x312   : > { %v1299_v27 = vpop.eup %1298 }
 0x313   : > { %v733_v28 = vmul.f32 %v1299_v27, %v1686_v44  ;;  %v702_v29 = vpop.xlane.xlu1 %701 }
 0x314   : > { %1304 = vrcp.f32 %v702_v29 }
 0x315   : > { %746 = vst.msk [vmem:[%s1724_s30 + $0x28] sm:$0xff] %vm597_vm4, %v733_v28 }
 0x316   : > { %v1301_v30 = vpop.eup %1300 }
 0x317   : > { %v734_v31 = vmul.f32 %v1301_v30, %v1691_v49  ;;  %v705_v32 = vpop.xlane.xlu0 %704 }
 0x318   : > { %1306 = vrcp.f32 %v705_v32 }
 0x319   : > { %747 = vst.msk [vmem:[%s1724_s30 + $0x30] sm:$0xff] %vm597_vm4, %v734_v31 }
 0x31a   : > { %v1303_v33 = vpop.eup %1302 }
 0x31b   : > { %v735_v34 = vmul.f32 %v1303_v33, %v1696_v54  ;;  %v708_v35 = vpop.xlane.xlu1 %707 }
 0x31c   : > { %1308 = vrcp.f32 %v708_v35 }
 0x31d   : > { %748 = vst.msk [vmem:[%s1724_s30 + $0x38] sm:$0xff] %vm597_vm4, %v735_v34 }
 0x31e   : > { %v1305_v36 = vpop.eup %1304 }
 0x31f   : > { %v736_v37 = vmul.f32 %v1305_v36, %v1701_v59  ;;  %v711_v38 = vpop.xlane.xlu0 %710 }
 0x320   : > { %1310 = vrcp.f32 %v711_v38 }
 0x321   : > { %749 = vst.msk [vmem:[%s1724_s30 + $0x40] sm:$0xff] %vm597_vm4, %v736_v37 }
 0x322   : > { %v1307_v39 = vpop.eup %1306 }
 0x323   : > { %v737_v40 = vmul.f32 %v1307_v39, %v1706_v0  ;;  %v714_v41 = vpop.xlane.xlu1 %713 }
 0x324   : > { %1312 = vrcp.f32 %v714_v41 }
 0x325   : > { %750 = vst.msk [vmem:[%s1724_s30 + $0x48] sm:$0xff] %vm597_vm4, %v737_v40 }
 0x326   : > { %v1309_v42 = vpop.eup %1308 }
 0x327   : > { %v738_v43 = vmul.f32 %v1309_v42, %v1710_v2 }
 0x329   : > { %751 = vst.msk [vmem:[%s1724_s30 + $0x50] sm:$0xff] %vm597_vm4, %v738_v43 }
 0x32a   : > { %v1311_v44 = vpop.eup %1310 }
 0x32b   : > { %v739_v45 = vmul.f32 %v1311_v44, %v1714_v7  ;;  %760 = sbr.rel (!%p1464_p4) target bundleno = 879 (0x36f), region = 44 }
 0x32d   : > { %752 = vst.msk [vmem:[%s1724_s30 + $0x58] sm:$0xff] %vm597_vm4, %v739_v45 }
 0x32e   : > { %v1313_v46 = vpop.eup %1312 }
 0x32f   : > { %v740_v47 = vmul.f32 %v1313_v46, %v1718_v8 }
 0x331   : > { %753 = vst.msk [vmem:[%s1724_s30 + $0x60] sm:$0xff] %vm597_vm4, %v740_v47 }
 0x332   : > { %s1867_s18 = smov (!%p763_p8, %s762_s18), 13 }
 0x333   : > { %s1049_s11 = sshll.u32 %s1867_s18, 7 }
 0x334   : > { %p1052_p9 = scmp.eq.s32.totalorder %s1049_s11, 0 }
 0x335   : > { %1314 = sdivrem.u32 (!%p1052_p9), %s1867_s18, 13 }
 0x336   : > { %771 = sbr.rel (%p1052_p9) target bundleno = 879 (0x36f), region = 48 }
 0x33e   : > { %s1777_s26 = spop.drf %1314 }
 0x33f   : > { %p1053_p10 = scmp.le.s32.totalorder %s1777_s26, 0 }
 0x340   : > { %s1860_s21 = smov (!%p1053_p10), %s1771_s10  ;;  %s1861_s6 = smov (!%p1053_p10), %s1724_s30 }
 0x341   : > { %975 = sbr.rel (%p1053_p10) target bundleno = 850 (0x352), region = 124  ;;  %s1786_s12 = smov (!%p1053_p10), 0  }
 0x342   : > { %s1788_s13 = smov (!%p1053_p10), 0  }
 0x348 LB: >> { %v859_v48 = vld [vmem:[%s1380_s6] sm:$0xff]  ;;  %v861_v49 = vld [vmem:[%s1380_s6 + $0x8] sm:$0xff]  ;;  %v863_v50 = vld [vmem:[%s1380_s6 + $0x10] sm:$0xff]  ;;  %s885_s14 = sadd.s32 1, %s1384_s12  ;;  %s853_s13 = sadd.s32 1, %s1388_s13   ;;  %s1388_s13 = sphi %s1788_s13, %s853_s13   ;;  %s1384_s12 = sphi %s1786_s12, %s1862_s12   ;;  %s1380_s6 = sphi %s1861_s6, %s890_s6   ;;  %s1376_s21 = sphi %s1860_s21, %s891_s21  }
 0x349   : >> { %860 = vst [vmem:[%s1376_s21] sm:$0xff] %v859_v48  ;;  %862 = vst [vmem:[%s1376_s21 + $0x8] sm:$0xff] %v861_v49  ;;  %v865_v51 = vld [vmem:[%s1380_s6 + $0x18] sm:$0xff]  ;;  %v867_v52 = vld [vmem:[%s1380_s6 + $0x20] sm:$0xff]  ;;  %p886_p11 = scmp.ge.s32.totalorder %s885_s14, %s1777_s26  ;;  %p852_p12 = scmp.ge.s32.totalorder %s853_s13, %s1777_s26 }
 0x34a   : >> { %864 = vst [vmem:[%s1376_s21 + $0x10] sm:$0xff] %v863_v50  ;;  %v869_v53 = vld [vmem:[%s1380_s6 + $0x28] sm:$0xff]  ;;  %866 = vst [vmem:[%s1376_s21 + $0x18] sm:$0xff] %v865_v51  ;;  %v871_v54 = vld [vmem:[%s1380_s6 + $0x30] sm:$0xff] }
 0x34b   : >> { %868 = vst [vmem:[%s1376_s21 + $0x20] sm:$0xff] %v867_v52  ;;  %870 = vst [vmem:[%s1376_s21 + $0x28] sm:$0xff] %v869_v53  ;;  %v873_v55 = vld [vmem:[%s1380_s6 + $0x38] sm:$0xff]  ;;  %v875_v56 = vld [vmem:[%s1380_s6 + $0x40] sm:$0xff]  ;;  %s1869_s14 = smov (%p886_p11, %s885_s14), 0  ;;  %855 = sbr.rel (!%p852_p12) target bundleno = 840 (0x348), region = 130 }
 0x34c   : >> { %872 = vst [vmem:[%s1376_s21 + $0x30] sm:$0xff] %v871_v54  ;;  %874 = vst [vmem:[%s1376_s21 + $0x38] sm:$0xff] %v873_v55  ;;  %v877_v58 = vld [vmem:[%s1380_s6 + $0x48] sm:$0xff]  ;;  %v879_v57 = vld [vmem:[%s1380_s6 + $0x50] sm:$0xff]  ;;  %s888_s15 = smul.u32 104, %s1869_s14  ;;  %s1862_s12 = smov %s1869_s14 }
 0x34d   : >> { %876 = vst [vmem:[%s1376_s21 + $0x40] sm:$0xff] %v875_v56  ;;  %v881_v59 = vld [vmem:[%s1380_s6 + $0x58] sm:$0xff]  ;;  %878 = vst [vmem:[%s1376_s21 + $0x48] sm:$0xff] %v877_v58  ;;  %v883_v60 = vld [vmem:[%s1380_s6 + $0x60] sm:$0xff] }
 0x34e   : >> { %880 = vst [vmem:[%s1376_s21 + $0x50] sm:$0xff] %v879_v57  ;;  %882 = vst [vmem:[%s1376_s21 + $0x58] sm:$0xff] %v881_v59  ;;  %s890_s6 = scalar_lea.vmem %s1724_s30, %s888_s15 [#allocation2]  }
 0x34f   : >> { %884 = vst [vmem:[%s1376_s21 + $0x60] sm:$0xff] %v883_v60  ;;  %s891_s21 = scalar_lea.vmem %s1771_s10, %s888_s15  }
 0x352 PF: > { %1316 = sdivrem.u32 %s1867_s18, 13 }
 0x353   : > { %s1054_s16 = smul.u32 104, %s1777_s26 }
 0x355   : > { %s896_s17 = scalar_lea.vmem %s1724_s30, %s1054_s16 [#allocation2]   ;;  %s898_s20 = scalar_lea.vmem %s1771_s10, %s1054_s16  }
 0x35b   : > { %s1317_s23 = spop.drf %1316 }
 0x35c   : > { %p1056_p13 = scmp.le.s32.totalorder %s1317_s23, 0 }
 0x35d   : > { %s1390_s24 = smov (!%p1056_p13), %s898_s20   ;;  %s1394_s27 = smov (!%p1056_p13), %s896_s17  }
 0x35e   : > { %989 = sbr.rel (%p1056_p13) target bundleno = 879 (0x36f), region = 135  ;;  %s1398_s28 = smov (!%p1056_p13), 0  }
 0x35f   : > { %s1402_s29 = smov (!%p1056_p13), 0  }
 0x365 LB: >> { %v908_v62 = vld [vmem:[%s1396_s27] sm:$0xff]  ;;  %s910_s7 = sadd.s32 1, %s1400_s28  ;;  %s902_s29 = sadd.s32 1, %s1404_s29   ;;  %s1404_s29 = sphi %s1402_s29, %s902_s29   ;;  %s1400_s28 = sphi %s1398_s28, %s1399_s28   ;;  %s1396_s27 = sphi %s1394_s27, %s915_s27   ;;  %s1392_s24 = sphi %s1390_s24, %s916_s24  }
 0x366   : >> { %909 = vst [vmem:[%s1392_s24] sm:$0xff] %v908_v62  ;;  %p911_p0 = scmp.ge.s32.totalorder %s910_s7, %s1317_s23  ;;  %p901_p1 = scmp.ge.s32.totalorder %s902_s29, %s1317_s23 }
 0x368   : >> { %s1871_s7 = smov (%p911_p0, %s910_s7), 0  ;;  %904 = sbr.rel (!%p901_p1) target bundleno = 869 (0x365), region = 141 }
 0x369   : >> { %s1057_s30 = sshll.u32 %s1871_s7, 3  ;;  %s1399_s28 = smov %s1871_s7  }
 0x36a   : >> { %s915_s27 = scalar_lea.vmem %s896_s17, %s1057_s30 [#allocation2]   ;;  %s916_s24 = scalar_lea.vmem %s898_s20, %s1057_s30  }
 0x36f PF: > { %p12_p2 = scmp.ge.s32.totalorder %s1454_s22, 4   ;;  %s1863_s18 = smov %s1368_s19 }
 0x370   : > { %s1864_s19 = smov %s1462_s25  ;;  %s1865_s20 = smov %s1454_s22 }
 0x371   :  { %14 = sbr.rel (!%p12_p2) target bundleno = 2 (0x2), region = 152 }

</bundles_post_ra>
